<compile_context>
chip_gen: v7x
topology: tpu7x:2x2x1
jax: 0.10.0
libtpu: 0.0.40
codegen_flags: <defaults>
</compile_context>

<pallas_src>
import math

import jax
import jax.numpy as jnp
from jax.experimental import pallas as pl
from jax.experimental.pallas import tpu as pltpu


_LANE = 128
_SUBLANE = 8
_MAX_LANE_WIDTH = 2048           # cap on block lane width
_BLOCK_BYTE_TARGET = 2 << 20     # ~2 MiB x-blocks (safe on v5e's 16 MiB scoped VMEM)


def _round_up(x, m):
    return ((x + m - 1) // m) * m


def _pick_lane_width(L):
    """Largest 128-multiple divisor of L (<= _MAX_LANE_WIDTH); None if L % 128 != 0."""
    if L % _LANE != 0:
        return None
    best = _LANE
    c = _LANE
    while c <= min(L, _MAX_LANE_WIDTH):
        if L % c == 0:
            best = c
        c += _LANE
    return best


def _drop_path_kernel(x_ref, scale_ref, o_ref):
    # (TR, TC) x-tile times (TR, 1) per-row scale: pure VPU broadcast-multiply.
    o_ref[...] = (x_ref[...].astype(jnp.float32) * scale_ref[...]).astype(o_ref.dtype)


def _drop_path_add_kernel(x_ref, scale_ref, res_ref, o_ref):
    # Fused residual: shortcut + x * scale (3 HBM passes instead of 5 unfused).
    o_ref[...] = (res_ref[...].astype(jnp.float32)
                  + x_ref[...].astype(jnp.float32) * scale_ref[...]).astype(o_ref.dtype)


def _call_drop_path(xr, scale_rows, res_r):
    """Tile the (R, W) slab and launch the kernel. No padding copies anywhere."""
    R, W = xr.shape
    itemsize = jnp.dtype(xr.dtype).itemsize

    # Lane (last-dim) tile.
    if W % _LANE == 0:
        TC = min(W, _MAX_LANE_WIDTH)        # lane-dense, unmasked stores
    elif W <= _MAX_LANE_WIDTH:
        TC = W                              # full-dim block (allowed by the rule)
    else:
        TC = _MAX_LANE_WIDTH                # 128-multiple block, ragged col tail
    grid_c = pl.cdiv(W, TC)

    # Sublane (row) tile: ~2 MiB x-block, >= 2 total grid steps when possible.
    if R <= _SUBLANE:
        TR = R                              # full-dim block
    else:
        target_rows = max(_SUBLANE, _BLOCK_BYTE_TARGET // max(1, TC * itemsize))
        TR = _round_up(min(target_rows, R), _SUBLANE)
        if grid_c == 1:
            # Guarantee >= 2 grid steps so v7x megacore can shard them.
            TR = min(TR, _round_up(pl.cdiv(R, 2), _SUBLANE))
        if TR >= R:
            TR = R                          # full-dim block is always legal
    grid_r = pl.cdiv(R, TR)

    x_spec = pl.BlockSpec((TR, TC), lambda i, j: (i, j))
    s_spec = pl.BlockSpec((TR, 1), lambda i, j: (i, 0))

    if res_r is None:
        kernel, in_specs, args = _drop_path_kernel, [x_spec, s_spec], (xr, scale_rows)
    else:
        kernel = _drop_path_add_kernel
        in_specs = [x_spec, s_spec, x_spec]
        args = (xr, scale_rows, res_r)

    return pl.pallas_call(
        kernel,
        out_shape=jax.ShapeDtypeStruct((R, W), xr.dtype),
        grid=(grid_r, grid_c),
        in_specs=in_specs,
        out_specs=x_spec,
        compiler_params=pltpu.CompilerParams(
            dimension_semantics=("parallel", "parallel")),
    )(*args)


def _per_sample_scale(key, B, keep_prob):
    # Matches torch: floor(keep_prob + U[0,1)) -> 0/1 mask, then / keep_prob.
    u = jax.random.uniform(key, (B,), dtype=jnp.float32)
    return jnp.floor(keep_prob + u) / keep_prob


def drop_path_pallas(x, drop_prob, training, key, *, shortcut=None,
                     min_pallas_bytes=256 * 1024):
    """Pallas DropPath forward.

    Returns drop_path(x) if `shortcut` is None, else shortcut + drop_path(x)
    (the fused form DropPath is always used in inside ViT residual blocks).
    """
    # Identity / trivial paths (match DropPath.forward semantics).
    if (drop_prob is None) or (drop_prob == 0.0) or (not training):
        return x if shortcut is None else shortcut + x
    if drop_prob >= 1.0:
        # keep_prob == 0: every sample dropped (avoid timm's 0/0 NaN).
        return jnp.zeros_like(x) if shortcut is None else shortcut

    B = x.shape[0]
    keep_prob = 1.0 - float(drop_prob)
    scale = _per_sample_scale(key, B, keep_prob)          # (B,) f32: 0 or 1/keep_prob

    L = math.prod(x.shape[1:])
    itemsize = jnp.dtype(x.dtype).itemsize

    # Small-input fast path: a single fused XLA multiply beats kernel launch +
    # layout plumbing for tiny activations.
    if x.size * itemsize < min_pallas_bytes:
        s = scale.reshape((B,) + (1,) * (x.ndim - 1))
        y = x.astype(jnp.float32) * s
        if shortcut is not None:
            y = shortcut.astype(jnp.float32) + y
        return y.astype(x.dtype)

    # ---- layout: dense (R, W) slab, free reshapes only ----
    C = _pick_lane_width(L)
    if C is not None:
        rows_per_sample = L // C
        W = C
    else:
        rows_per_sample = 1
        W = L
    R = B * rows_per_sample

    xr = x.reshape(R, W)
    res_r = None if shortcut is None else shortcut.reshape(R, W)
    if rows_per_sample == 1:
        scale_rows = scale.reshape(R, 1)
    else:
        scale_rows = jnp.repeat(scale, rows_per_sample).reshape(R, 1)

    out = _call_drop_path(xr, scale_rows, res_r)
    return out.reshape(x.shape)


if __name__ == "__main__":
    key = jax.random.PRNGKey(0)
    kx, kr, kmask = jax.random.split(key, 3)

    drop_prob = 0.25
    keep_prob = 1.0 - drop_prob

    def ref_scale(k, b):
        u = jax.random.uniform(k, (b,), dtype=jnp.float32)
        return jnp.floor(keep_prob + u) / keep_prob

    # 1) Token layout DropPath sees inside EVA-ViT blocks (small, force Pallas path).
    B, N, D = 2, 8, 32
    x = jax.random.normal(kx, (B, N, D), dtype=jnp.float32)
    y = jax.block_until_ready(
        drop_path_pallas(x, drop_prob, training=True, key=kmask, min_pallas_bytes=0))
    s = ref_scale(kmask, B).reshape(B, 1, 1)
    y_ref = (x * s).astype(x.dtype)
    assert y.shape == x.shape and y.dtype == x.dtype
    assert jnp.allclose(y, y_ref, atol=1e-6, rtol=1e-6)

    # 2) Multi-step grid (two row tiles), 128-divisible inner size.
    x1 = jax.random.normal(kx, (4, 64, 128), dtype=jnp.float32)
    y1 = jax.block_until_ready(
        drop_path_pallas(x1, drop_prob, training=True, key=kmask, min_pallas_bytes=0))
    s1 = ref_scale(kmask, 4).reshape(4, 1, 1)
    assert jnp.allclose(y1, x1 * s1, atol=1e-6, rtol=1e-6)

    # 3) Ragged inner size (L % 128 != 0) -> full-L lane block, no pad copies.
    x2 = jax.random.normal(kx, (3, 7, 20), dtype=jnp.float32)
    y2 = jax.block_until_ready(
        drop_path_pallas(x2, drop_prob, training=True, key=kmask, min_pallas_bytes=0))
    s2 = ref_scale(kmask, 3).reshape(3, 1, 1)
    assert jnp.allclose(y2, x2 * s2, atol=1e-6, rtol=1e-6)

    # 4) bf16: multiply in f32, cast on store (documented deviation from timm's
    #    in-dtype x.div(keep_prob)).
    xb = x.astype(jnp.bfloat16)
    yb = jax.block_until_ready(
        drop_path_pallas(xb, drop_prob, training=True, key=kmask, min_pallas_bytes=0))
    yb_ref = (xb.astype(jnp.float32) * s).astype(jnp.bfloat16)
    assert yb.dtype == jnp.bfloat16
    assert jnp.allclose(yb.astype(jnp.float32), yb_ref.astype(jnp.float32),
                        atol=1e-2, rtol=1e-2)

    # 5) Fused residual add: shortcut + drop_path(x).
    r = jax.random.normal(kr, (B, N, D), dtype=jnp.float32)
    yf = jax.block_until_ready(
        drop_path_pallas(x, drop_prob, training=True, key=kmask, shortcut=r,
                         min_pallas_bytes=0))
    assert jnp.allclose(yf, r + x * s, atol=1e-6, rtol=1e-6)

    # 6) Identity paths + drop_prob == 1.0 guard.
    assert jnp.array_equal(
        jax.block_until_ready(drop_path_pallas(x, drop_prob, training=False, key=kmask)), x)
    assert jnp.array_equal(
        jax.block_until_ready(drop_path_pallas(x, 0.0, training=True, key=kmask)), x)
    assert jnp.array_equal(
        jax.block_until_ready(drop_path_pallas(x, 1.0, training=True, key=kmask)),
        jnp.zeros_like(x))

    print("KERNEL_OK")
</pallas_src>

<mosaic_0001>
module attributes {stable_mosaic.version = 11 : i64} {
  func.func @_drop_path_kernel(%arg0: i32, %arg1: i32, %arg2: memref<2x256xf32, #tpu.memory_space<vmem>>, %arg3: memref<2x1xf32, #tpu.memory_space<vmem>>, %arg4: memref<2x256xf32, #tpu.memory_space<vmem>>) attributes {dimension_semantics = [#tpu.dimension_semantics<parallel>, #tpu.dimension_semantics<parallel>], iteration_bounds = array<i64: 1, 1>, scalar_prefetch = 0 : i64, scratch_operands = 0 : i64, tpu.core_type = #tpu.core_type<tc>, window_params = [{transform_indices = @transform_0, window_bounds = array<i64: 2, 256>}, {transform_indices = @transform_1, window_bounds = array<i64: 2, 1>}, {transform_indices = @transform_2, window_bounds = array<i64: 2, 256>}]} {
    %c0 = arith.constant 0 : index
    %c0_0 = arith.constant 0 : index
    %0 = vector.load %arg2[%c0, %c0_0] : memref<2x256xf32, #tpu.memory_space<vmem>>, vector<2x256xf32>
    %c0_1 = arith.constant 0 : index
    %c0_2 = arith.constant 0 : index
    %1 = vector.load %arg3[%c0_1, %c0_2] : memref<2x1xf32, #tpu.memory_space<vmem>>, vector<2x1xf32>
    %2 = vector.broadcast %1 : vector<2x1xf32> to vector<2x256xf32>
    %3 = arith.mulf %0, %2 : vector<2x256xf32>
    %c0_3 = arith.constant 0 : index
    %c0_4 = arith.constant 0 : index
    %4 = vector.load %arg4[%c0_3, %c0_4] : memref<2x256xf32, #tpu.memory_space<vmem>>, vector<2x256xf32>
    tpu.vector_store %arg4[%c0_3, %c0_4], %3 {strides = array<i32>} : memref<2x256xf32, #tpu.memory_space<vmem>>, vector<2x256xf32>,
    return
  }
  func.func @transform_0(%arg0: i32, %arg1: i32) -> (i32, i32) {
    %c0_i32 = arith.constant 0 : i32
    return %arg0, %arg1 : i32, i32
  }
  func.func @transform_1(%arg0: i32, %arg1: i32) -> (i32, i32) {
    %c0_i32 = arith.constant 0 : i32
    %c0_i32_0 = arith.constant 0 : i32
    return %arg0, %c0_i32 : i32, i32
  }
  func.func @transform_2(%arg0: i32, %arg1: i32) -> (i32, i32) {
    %c0_i32 = arith.constant 0 : i32
    return %arg0, %arg1 : i32, i32
  }
}

</mosaic_0001>

<bundles_post_ra>
// kernel: tpu_custom_call.1
= control target key start
LH: loop header
LB: loop body
LE: loop exit
PB: predicated region body
PF: predicated region fallthrough
CT: control target
= control target key end

     0   :  { %7 = vsyncpa [#allocation3], 0  ;;  %s154_s0 = inlined_call_operand.hbm [shape: f32[2,256], index: 0, kind: input, shape index: {}]   ;;  %s155_s1 = inlined_call_operand.vmem [shape: f32[2,1], index: 1, kind: input, shape index: {}]   ;;  %s156_s2 = inlined_call_operand.hbm [shape: f32[2,256], index: 2, kind: output, shape index: {}]  }
   0x1   :  { %8 = vsyncpa [#allocation4], 0  ;;  %s108_s9 = smov [#allocation2]   ;;  %s60_s13 = scalar_lea.hbm %s154_s0, 64 }
   0x2   :  { %s15_s10 = sshll.u32 %s108_s9, 4  ;;  %p61_p0 = scmp.ne.s32.totalorder %s154_s0, %s60_s13  ;;  %s16_s10 = int_to_ptr.vmem [resolvable:$true] %s15_s10 }
   0x3   :  { %p64_p1 = scmp.lt.u32.totalorder %s60_s13, %s154_s0 }
   0x5   :  { %p66_p2 = pnand %p64_p1, %p61_p0 }
   0x7   :  { %69 = shalt.err (!%p66_p2)
}
   0x8   :  { %s70_s18 = scalar_lea.vmem %s16_s10, 64  ;;  %p75_p4 = scmp.lt.s32.totalorder %s16_s10, %s16_s10 }
   0x9   :  { %p71_p3 = scmp.ne.s32.totalorder %s16_s10, %s70_s18  ;;  %p76_p5 = scmp.lt.s32.totalorder %s70_s18, %s70_s18 }
   0xb   :  { %p77_p6 = por %p76_p5, %p75_p4 }
   0xd   :  { %p78_p7 = pnand %p77_p6, %p71_p3 }
   0xf   :  { %81 = shalt.err (!%p78_p7)
}
  0x10   :  { %18 = dma.hbm_to_vmem [thread:$0]  %s154_s0, 64, %s16_s10, [#allocation3]  }
  0x11   :  { %104 = dma.done.wait [#allocation3], 64  }
  0x12   :  { %105 = vsyncadd [#allocation3], 4294967232  ;;  %v109_v0 = vmov 0   ;;  %v25_v1 = vld [vmem:[%s155_s1] sm:$0x3]  ;;  %v33_v4 = vlaneseq  ;;  %s111_s23 = smov [#allocation5]  }
  0x13   :  { %59 = vset.pattern.permute.xlu0 %v109_v0  ;;  %v110_v2 = vmov 269488144   ;;  %v24_v9 = vld [vmem:[#allocation2] sm:$0xf]  ;;  %s46_s24 = sshll.u32 %s111_s23, 4  ;;  %s47_s24 = int_to_ptr.vmem [resolvable:$true] %s46_s24 }
  0x14   :  { %28 = vperm.xlu0 %59, %v25_v1   ;;  %v31_v3 = vunpack.c.l.s4 %v110_v2  ;;  %v34_v6 = vshrl.u32 %v33_v4, 7  ;;  %s82_s0 = scalar_lea.vmem %s47_s24, 64  ;;  %p87_p9 = scmp.lt.s32.totalorder %s47_s24, %s47_s24 }
  0x15   :  { %p83_p8 = scmp.ne.s32.totalorder %s47_s24, %s82_s0  ;;  %p88_p10 = scmp.lt.s32.totalorder %s82_s0, %s82_s0 }
  0x16   :  { %v32_v5 = vunpack.c.0.s8 %v31_v3 }
  0x17   :  { %p89_p11 = por %p88_p10, %p87_p9 }
  0x18   :  { %v35_v7 = vsub.s32 %v32_v5, %v34_v6 }
  0x19   :  { %p90_p12 = pnand %p89_p11, %p83_p8 }
  0x93   :  { %v29_v8 = vpop.permute.xlu0 %28 }
  0x94   :  { %v36_v10 = vrot.slane %v29_v8, %v35_v7 }
  0x96   :  { %v38_v11 = vmul.f32 %v36_v10, %v24_v9 }
  0x98   :  { %39 = vst [vmem:[#allocation5] sm:$0xf] %v38_v11 }
  0x99   :  { %93 = shalt.err (!%p90_p12)
}
  0x9a   :  { %s94_s26 = scalar_lea.hbm %s156_s2, 64 }
  0x9b   :  { %p95_p13 = scmp.ne.s32.totalorder %s156_s2, %s94_s26  ;;  %p98_p0 = scmp.lt.u32.totalorder %s94_s26, %s156_s2 }
  0x9d   :  { %p100_p1 = pnand %p98_p0, %p95_p13 }
  0x9f   :  { %103 = shalt.err (!%p100_p1)
}
  0xa0   :  { %49 = dma.vmem_to_hbm [thread:$0]  %s47_s24, 64, %s156_s2, [#allocation4]  }
  0xa1   :  { %106 = dma.done.wait [#allocation4], 64  }
  0xa2   :  { %107 = vsyncadd [#allocation4], 4294967232 }
  0xa3   :  { %53 = vsyncpa [#allocation3], 1 }
  0xa4   :  { %54 = vsyncpa [#allocation4], 1 }

</bundles_post_ra>
